<compile_context>
chip_gen: v7x
topology: tpu7x:2x2x1
jax: 0.10.0
libtpu: 0.0.40
codegen_flags: <defaults>
</compile_context>

<pallas_src>
import jax
import jax.numpy as jnp
from jax import lax
from jax.experimental import pallas as pl
from jax.experimental.pallas import tpu as pltpu

_LANE = 128
_SUBLANE = 8


def _round_up(x, m):
    return (x + m - 1) // m * m


def _tpu_vmem_and_kind():
    """Return (physical VMEM bytes per TensorCore, device-kind string)."""
    kind = ""
    try:
        kind = jax.devices()[0].device_kind.lower()
    except Exception:
        pass
    phys = None
    try:
        phys = int(pltpu.get_tpu_info().vmem_capacity_bytes)
    except Exception:
        phys = None
    if phys is None:
        # v7x has 64 MiB VMEM per TensorCore; v5e/v6e have 128 MiB.
        phys = (64 << 20) if "v7" in kind else (128 << 20)
    return phys, kind


# ----------------------------------------------------------------- kernels ---

def _embed_onehot_kernel(ids_ref, table_ref, out_ref):
    """Table resident in VMEM; gather TB rows via a one-hot matmul on the MXU."""
    ids = ids_ref[...]                                        # (TB, 1) int32
    tb = ids.shape[0]
    v = table_ref.shape[0]
    iota = lax.broadcasted_iota(jnp.int32, (tb, v), 1)        # (TB, V)
    onehot = (iota == ids).astype(table_ref.dtype)            # (TB, V)
    out_ref[...] = jnp.dot(
        onehot, table_ref[...], preferred_element_type=jnp.float32
    ).astype(out_ref.dtype)


def _embed_gather_kernel(ids_ref, table_ref, out_ref, sem_ref):
    """Table in HBM; TB concurrent row DMAs straight into the output block."""
    i = pl.program_id(0)
    tb = out_ref.shape[0]
    base = i * tb
    # Issue all TB row gathers (they run concurrently) directly into out_ref —
    # no VMEM staging buffer and no final (TB, D) copy pass.
    for t in range(tb):
        row = ids_ref[base + t]
        pltpu.make_async_copy(
            table_ref.at[pl.ds(row, 1), :],
            out_ref.at[pl.ds(t, 1), :],
            sem_ref,
        ).start()
    # Single aggregated drain: the shared DMA semaphore accumulates completed
    # bytes, and the TB row copies sum to exactly one (TB, D) block.
    pltpu.make_async_copy(out_ref, out_ref, sem_ref).wait()
    # TODO(synk): cross-grid-step prefetch of block i+1's rows (manual P4
    # double-buffer) would hide the DMA tail latency; per-row descriptor issue
    # dominates here, so it is omitted to keep the output path copy-free.


# ----------------------------------------------------------------- wrapper ---

def embedding_lookup(ids, table, *, block_tokens=256, force_gather=False):
    """nn.Embedding forward: ids (m, T) int -> (m, T, D) rows of `table` (V, D)."""
    m, T = ids.shape
    V, D = table.shape
    n_tok = m * T
    dtype_bytes = jnp.dtype(table.dtype).itemsize

    # Clamp out-of-range ids so both paths are well-defined (nn.Embedding UB).
    flat_ids = jnp.clip(ids.reshape(-1).astype(jnp.int32), 0, V - 1)

    # Token block: multiple of 8 sublanes; 256 fills the v6e/v7x MXU M-dim and
    # amortizes the ~0.35us/grid-step overhead.
    TB = min(int(block_tokens), _round_up(n_tok, _SUBLANE))
    TB = _round_up(TB, _SUBLANE)
    n_tok_pad = _round_up(n_tok, TB)
    if n_tok_pad != n_tok:
        flat_ids = jnp.pad(flat_ids, (0, n_tok_pad - n_tok))  # pad with row 0 (valid)
    n_blocks = n_tok_pad // TB

    D_pad = _round_up(D, _LANE)

    phys_vmem, kind = _tpu_vmem_and_kind()
    budget = (3 * phys_vmem) // 4          # ~96 MiB on v5e/v6e, ~48 MiB on v7x

    # One-hot cost cap: f32 on v5e pushes V-proportional selection FLOPs through
    # a multi-pass 128x128 MXU, so keep it small there; otherwise VMEM fit rules.
    if dtype_bytes >= 4 and not ("v6" in kind or "v7" in kind):
        onehot_max_v = 2048
    else:
        onehot_max_v = 8192

    # Resident-path VMEM footprint, counting the table's default 2x pipeline
    # buffering, double-buffered ids/output blocks, and one-hot temporaries.
    resident_bytes = (
        2 * V * D_pad * dtype_bytes                      # table (2 pipeline buffers)
        + 2 * TB * 4 + 2 * TB * D_pad * dtype_bytes      # ids + output blocks
        + TB * V * (4 + dtype_bytes)                     # iota + one-hot temporaries
        + TB * D_pad * 4                                 # f32 matmul accumulator
    )
    use_resident = ((not force_gather)
                    and V <= onehot_max_v
                    and resident_bytes <= budget)

    if use_resident:
        # Lane-dense output: pad D to a multiple of 128 in the wrapper, slice after.
        table_p = table if D_pad == D else jnp.pad(table, ((0, 0), (0, D_pad - D)))
        ids_col = flat_ids.reshape(n_tok_pad, 1)
        vmem_limit = min(budget, max(32 << 20, int(resident_bytes * 1.25)))
        cparams = pltpu.CompilerParams(
            dimension_semantics=("parallel",),           # tokens independent
            vmem_limit_bytes=vmem_limit,
        )
        cost = pl.CostEstimate(
            flops=2 * n_tok_pad * V * D_pad,
            transcendentals=0,
            bytes_accessed=(V * D_pad + n_tok_pad * D_pad) * dtype_bytes
            + n_tok_pad * 4,
        )
        out = pl.pallas_call(
            _embed_onehot_kernel,
            out_shape=jax.ShapeDtypeStruct((n_tok_pad, D_pad), table.dtype),
            grid=(n_blocks,),
            in_specs=[
                pl.BlockSpec((TB, 1), lambda i: (i, 0)),       # this block's ids
                pl.BlockSpec((V, D_pad), lambda i: (0, 0)),    # full table, resident
            ],
            out_specs=pl.BlockSpec((TB, D_pad), lambda i: (i, 0)),
            compiler_params=cparams,
            cost_estimate=cost,
        )(ids_col, table_p)
        out = out[:n_tok, :D]
    else:
        gather_bytes = 2 * TB * D * dtype_bytes + TB * 4
        vmem_limit = min(budget, max(32 << 20, int(gather_bytes * 2)))
        cparams = pltpu.CompilerParams(
            dimension_semantics=("parallel",),
            vmem_limit_bytes=vmem_limit,
        )
        cost = pl.CostEstimate(
            flops=0,
            transcendentals=0,
            bytes_accessed=2 * n_tok_pad * D * dtype_bytes + n_tok_pad * 4,
        )
        out = pl.pallas_call(
            _embed_gather_kernel,
            out_shape=jax.ShapeDtypeStruct((n_tok_pad, D), table.dtype),
            grid_spec=pltpu.PrefetchScalarGridSpec(
                num_scalar_prefetch=1,                         # flat ids -> SMEM
                grid=(n_blocks,),
                in_specs=[pl.BlockSpec(memory_space=pl.ANY)],  # table stays in HBM
                out_specs=pl.BlockSpec((TB, D), lambda i, ids: (i, 0)),
                scratch_shapes=[
                    pltpu.SemaphoreType.DMA,                   # one shared DMA sem
                ],
            ),
            compiler_params=cparams,
            cost_estimate=cost,
        )(flat_ids, table)
        out = out[:n_tok]

    return out.reshape(m, T, D)


if __name__ == "__main__":
    key = jax.random.PRNGKey(0)
    k_table, k_ids = jax.random.split(key)

    # Small shapes consistent with the module's forward: batch m=2, seq T=8.
    lexicon_size, embed_dim = 64, 32
    m, T = 2, 8

    # nn.Embedding default init is N(0, 1) — reproduce deterministically.
    table = jax.random.normal(k_table, (lexicon_size, embed_dim), dtype=jnp.float32)
    ids = jax.random.randint(k_ids, (m, T), 0, lexicon_size, dtype=jnp.int32)

    ref = jnp.take(table, ids, axis=0)

    # Fast path: table resident in VMEM, gather = one-hot MXU matmul.
    emb = jax.block_until_ready(embedding_lookup(ids, table))
    assert emb.shape == (m, T, embed_dim)
    assert emb.dtype == table.dtype
    assert jnp.allclose(emb, ref, rtol=1e-5, atol=1e-5)

    # General path: table in HBM, row DMAs straight into the output block.
    emb2 = jax.block_until_ready(embedding_lookup(ids, table, force_gather=True))
    assert emb2.shape == (m, T, embed_dim)
    assert jnp.allclose(emb2, ref)

    print("KERNEL_OK")
</pallas_src>

<mosaic_0001>
module attributes {stable_mosaic.version = 11 : i64} {
  func.func @_embed_onehot_kernel(%arg0: i32, %arg1: memref<16x1xi32, #tpu.memory_space<vmem>>, %arg2: memref<64x128xf32, #tpu.memory_space<vmem>>, %arg3: memref<16x128xf32, #tpu.memory_space<vmem>>) attributes {dimension_semantics = [#tpu.dimension_semantics<parallel>], iteration_bounds = array<i64: 1>, scalar_prefetch = 0 : i64, scratch_operands = 0 : i64, tpu.core_type = #tpu.core_type<tc>, window_params = [{transform_indices = @transform_0, window_bounds = array<i64: 16, 1>}, {pipeline_mode = #tpu.pipeline_mode<synchronous>, transform_indices = @transform_1, window_bounds = array<i64: 64, 128>}, {transform_indices = @transform_2, window_bounds = array<i64: 16, 128>}]} {
    %c0 = arith.constant 0 : index
    %c0_0 = arith.constant 0 : index
    %0 = vector.load %arg1[%c0, %c0_0] : memref<16x1xi32, #tpu.memory_space<vmem>>, vector<16x1xi32>
    %1 = tpu.iota {dimensions = array<i32: 1>} : vector<16x64xi32>
    %2 = vector.broadcast %0 : vector<16x1xi32> to vector<16x64xi32>
    %3 = arith.cmpi eq, %1, %2 : vector<16x64xi32>
    %4 = arith.extui %3 : vector<16x64xi1> to vector<16x64xi32>
    %5 = arith.sitofp %4 : vector<16x64xi32> to vector<16x64xf32>
    %c0_1 = arith.constant 0 : index
    %c0_2 = arith.constant 0 : index
    %6 = vector.load %arg2[%c0_1, %c0_2] : memref<64x128xf32, #tpu.memory_space<vmem>>, vector<64x128xf32>
    %cst = arith.constant dense<0.000000e+00> : vector<16x128xf32>
    %7 = tpu.matmul %5, %6, %cst {dimension_numbers = #tpu.dot_dimension_numbers<[1], [0], [0], [1], [0, 0, 1, 1], [], []>} : vector<16x64xf32>, vector<64x128xf32>, vector<16x128xf32> -> vector<16x128xf32>
    %c0_3 = arith.constant 0 : index
    %c0_4 = arith.constant 0 : index
    %8 = vector.load %arg3[%c0_3, %c0_4] : memref<16x128xf32, #tpu.memory_space<vmem>>, vector<16x128xf32>
    tpu.vector_store %arg3[%c0_3, %c0_4], %7 {strides = array<i32>} : memref<16x128xf32, #tpu.memory_space<vmem>>, vector<16x128xf32>,
    return
  }
  func.func @transform_0(%arg0: i32) -> (i32, i32) {
    %c0_i32 = arith.constant 0 : i32
    %c0_i32_0 = arith.constant 0 : i32
    return %arg0, %c0_i32 : i32, i32
  }
  func.func @transform_1(%arg0: i32) -> (i32, i32) {
    %c0_i32 = arith.constant 0 : i32
    %c0_i32_0 = arith.constant 0 : i32
    %c0_i32_1 = arith.constant 0 : i32
    return %c0_i32, %c0_i32_0 : i32, i32
  }
  func.func @transform_2(%arg0: i32) -> (i32, i32) {
    %c0_i32 = arith.constant 0 : i32
    %c0_i32_0 = arith.constant 0 : i32
    return %arg0, %c0_i32 : i32, i32
  }
}

</mosaic_0001>

<bundles_post_ra>
// kernel: tpu_custom_call.1
= control target key start
LH: loop header
LB: loop body
LE: loop exit
PB: predicated region body
PF: predicated region fallthrough
CT: control target
= control target key end

     0   :  { %7 = vsyncpa [#allocation3], 0  ;;  %s312_s0 = inlined_call_operand.vmem [shape: s32[16,1], index: 0, kind: input, shape index: {}]   ;;  %s313_s1 = inlined_call_operand.hbm [shape: f32[64,128], index: 1, kind: input, shape index: {}]   ;;  %s314_s2 = inlined_call_operand.hbm [shape: f32[16,128], index: 2, kind: output, shape index: {}]  }
   0x1   :  { %8 = vsyncpa [#allocation4], 0  ;;  %s255_s9 = smov [#allocation2]   ;;  %s207_s13 = scalar_lea.hbm %s313_s1, 1024 }
   0x2   :  { %s16_s10 = sshll.u32 %s255_s9, 4  ;;  %p208_p0 = scmp.ne.s32.totalorder %s313_s1, %s207_s13  ;;  %s17_s10 = int_to_ptr.vmem [resolvable:$true] %s16_s10 }
   0x3   :  { %p211_p1 = scmp.lt.u32.totalorder %s207_s13, %s313_s1 }
   0x5   :  { %p213_p2 = pnand %p211_p1, %p208_p0 }
   0x7   :  { %216 = shalt.err (!%p213_p2)
}
   0x8   :  { %s217_s18 = scalar_lea.vmem %s17_s10, 1024  ;;  %p222_p4 = scmp.lt.s32.totalorder %s17_s10, %s17_s10 }
   0x9   :  { %p218_p3 = scmp.ne.s32.totalorder %s17_s10, %s217_s18  ;;  %p223_p5 = scmp.lt.s32.totalorder %s217_s18, %s217_s18 }
   0xb   :  { %p224_p6 = por %p223_p5, %p222_p4 }
   0xd   :  { %p225_p7 = pnand %p224_p6, %p218_p3 }
   0xf   :  { %228 = shalt.err (!%p225_p7)
}
  0x10   :  { %s256_s19 = smov 128   ;;  %s257_s20 = smov 8  }
  0x11   :  { %22 = dma.hbm_to_vmem [thread:$0]  %s313_s1, 1024, %s17_s10, [#allocation3], %s256_s19, %s256_s19, %s257_s20  }
  0x12   :  { %251 = dma.done.wait [#allocation3], 1024  }
  0x13   :  { %252 = vsyncadd [#allocation3], 4294966272  ;;  %v258_v0 = vmov 0   ;;  %v26_v1 = vld [vmem:[%s312_s0] sm:$0xff]  ;;  %v43_v3 = vld [vmem:[#allocation2 + $0x8] sm:$0xff]  ;;  %v28_v15 = vlaneseq  ;;  %vm50_vm0 = vcmask 523264  }
  0x14   :  { %206 = vset.pattern.permute.xlu0 %v258_v0  ;;  %v42_v2 = vld [vmem:[#allocation2] sm:$0xff]  ;;  %v44_v4 = vld [vmem:[#allocation2 + $0x10] sm:$0xff]  ;;  %v45_v5 = vld [vmem:[#allocation2 + $0x18] sm:$0xff]  ;;  %v259_v18 = vmov 0.0  }
  0x15   :  { %31 = vperm.xlu0 %206, %v26_v1   ;;  %v27_v6 = vld [vmem:[%s312_s0 + $0x8] sm:$0xff]  ;;  %v184_v7 = vpack.c.bf16 %v43_v3, %v42_v2  ;;  %v188_v8 = vpack.c.bf16 %v45_v5, %v44_v4  ;;  %v46_v9 = vld [vmem:[#allocation2 + $0x20] sm:$0xff]  ;;  %v48_v12 = vld [vmem:[#allocation2 + $0x30] sm:$0xff]  ;;  %v29_v16 = vand.u32 127, %v28_v15  ;;  %s260_s0 = smov [#allocation5]  }
  0x16   :  { %v47_v10 = vld [vmem:[#allocation2 + $0x28] sm:$0xff]  ;;  %v49_v13 = vld [vmem:[#allocation2 + $0x38] sm:$0xff]  ;;  %s139_s1 = sshll.u32 %s260_s0, 4  ;;  %s140_s1 = int_to_ptr.vmem [resolvable:$true] %s139_s1 }
  0x17   :  { %185 = vmatprep.subr.bf16.mxu0 %v184_v7  ;;  %v192_v11 = vpack.c.bf16 %v47_v10, %v46_v9  ;;  %v196_v14 = vpack.c.bf16 %v49_v13, %v48_v12  ;;  %s229_s27 = scalar_lea.vmem %s140_s1, 256  ;;  %p234_p9 = scmp.lt.s32.totalorder %s140_s1, %s140_s1 }
  0x18   :  { %187 = vmatpush3.bf16.msra.mxu0 %v184_v7  ;;  %p230_p8 = scmp.ne.s32.totalorder %s140_s1, %s229_s27  ;;  %p235_p10 = scmp.lt.s32.totalorder %s229_s27, %s229_s27 }
  0x19   :  { %34 = vperm.xlu0 %206, %v27_v6   ;;  %189 = vmatprep.subr.bf16.mxu0 %v188_v8 }
  0x1a   :  { %p236_p11 = por %p235_p10, %p234_p9 }
  0x1c   :  { %191 = vmatpush3.bf16.msra.mxu0 %v188_v8  ;;  %p237_p12 = pnand %p236_p11, %p230_p8 }
  0x1d   :  { %193 = vmatprep.subr.bf16.mxu0 %v192_v11 }
  0x20   :  { %195 = vmatpush3.bf16.msra.mxu0 %v192_v11 }
  0x21   :  { %197 = vmatprep.subr.bf16.mxu0 %v196_v14 }
  0x24   :  { %199 = vmatpush3.bf16.msra.mxu0 %v196_v14 }
  0x94   :  { %v32_v17 = vpop.permute.xlu0 %31 }
  0x95   :  { %vm36_vm1 = vcmp.eq.s32.totalorder %v29_v16, %v32_v17 }
  0x96   :  { %v151_v19 = vsel %vm36_vm1, 1.0, %v259_v18 }
  0x97   :  { %181 = vmatprep.mubr.msk.f32.mxu0 %vm50_vm0, %v151_v19 }
  0x98   :  { %v35_v20 = vpop.permute.xlu0 %34 }
  0x99   :  { %vm37_vm2 = vcmp.eq.s32.totalorder %v29_v16, %v35_v20 }
  0x9a   :  { %v152_v21 = vsel %vm37_vm2, 1.0, %v259_v18 }
  0x9b   :  { %182 = vmatmul.mubr.msk.f32.vlgmr.msra.gmra.mrb[0].mxu0 %vm50_vm0, %v152_v21 }
 0x16e   :  { %v183_v22 = vpop.f32.mrb[0].mxu0 }
 0x16f   :  { %133 = vst [vmem:[#allocation5 + $0x8] sm:$0xff] %v183_v22  ;;  %v123_v23 = vpop.f32.mrb[1].mxu0 }
 0x170   :  { %132 = vst [vmem:[#allocation5] sm:$0xff] %v123_v23 }
 0x171   :  { %240 = shalt.err (!%p237_p12)
}
 0x172   :  { %s241_s30 = scalar_lea.hbm %s314_s2, 256 }
 0x173   :  { %p242_p13 = scmp.ne.s32.totalorder %s314_s2, %s241_s30  ;;  %p245_p0 = scmp.lt.u32.totalorder %s241_s30, %s314_s2 }
 0x175   :  { %p247_p1 = pnand %p245_p0, %p242_p13 }
 0x177   :  { %250 = shalt.err (!%p247_p1)
}
 0x178   :  { %145 = dma.vmem_to_hbm [thread:$0]  %s140_s1, 256, %s314_s2, [#allocation4], %s256_s19, %s256_s19, %s257_s20  }
 0x179   :  { %253 = dma.done.wait [#allocation4], 256  }
 0x17a   :  { %254 = vsyncadd [#allocation4], 4294967040 }
 0x17b   :  { %149 = vsyncpa [#allocation3], 1 }
 0x17c   :  { %150 = vsyncpa [#allocation4], 1 }

</bundles_post_ra>
